<compile_context>
chip_gen: v7x
topology: tpu7x:2x2x1
jax: 0.10.0
libtpu: 0.0.40
codegen_flags: <defaults>
</compile_context>

<pallas_src>
import functools

import jax
import jax.numpy as jnp
from jax.experimental import pallas as pl
from jax.experimental.pallas import tpu as pltpu


def _round_up(x, m):
    return ((x + m - 1) // m) * m


def _tpu_info():
    """Return (physical VMEM bytes per TensorCore, TensorCores per chip).

    Uses pltpu.get_tpu_info() when available and falls back to a
    device-kind heuristic (v7x: 64 MiB / 2 cores, v5e/v6e: 128 MiB / 1 core).
    """
    vmem = None
    try:
        vmem = int(pltpu.get_tpu_info().vmem_capacity_bytes)
    except Exception:
        vmem = None
    try:
        kind = jax.devices()[0].device_kind.lower()
    except Exception:
        kind = ""
    is_v7 = ("v7" in kind) or ("7x" in kind)
    if vmem is None:
        vmem = (64 << 20) if is_v7 else (128 << 20)
    num_cores = 2 if is_v7 else 1
    return vmem, num_cores


def _reeig_kernel(e_ref, v_ref, o_ref, *, ep):
    # e_ref: (TB, 1, N) eigenvalues
    # v_ref: (TB, N, N) eigenvectors (columns)
    # o_ref: (TB, N, N) reconstructed matrices
    e = jnp.maximum(e_ref[...], ep)          # e[e < ep] = ep  (ep is a static literal)
    v = v_ref[...]                           # (TB, N, N)
    # V @ diag(e): scale column j of each V by e[j] (broadcast (TB,1,N) over rows).
    scaled = v * e
    # (V diag(e)) @ V^T, contracting on the *last* axis of BOTH operands so the
    # MXU is fed in the original layout (no materialized transpose requested).
    # If a bundle dump ever shows a V^T relayout, the equivalent
    # A = V*sqrt(e); A @ A^T form keeps only one scaled operand live.
    # Precision note: default TPU matmul precision is used here (matches the
    # pure-JAX reference); pass precision=lax.Precision.HIGHEST if bit-accurate
    # f32 reconstruction is required.
    out = jnp.einsum("bij,bkj->bik", scaled, v,
                     preferred_element_type=jnp.float32)
    o_ref[...] = out.astype(o_ref.dtype)


def _choose_tb(B, N, budget_bytes, num_cores):
    """Largest batch tile TB such that:
       (a) TB divides B,
       (b) the (8,128)-padded per-step VMEM footprint fits budget_bytes,
           counting double-buffered v/out pipeline blocks, the double-buffered
           eigenvalue block, and ~2 block-sized f32 in-kernel temporaries,
       (c) on multi-core chips (v7x) the grid keeps >= 2 steps per core so the
           per-core pipeline still has DMAs to overlap; single-core chips get
           no artificial cap (bigger blocks -> closer to the HBM roofline)."""
    itemsize = 4  # f32
    mat = _round_up(N, 8) * _round_up(max(N, 1), 128) * itemsize   # padded (N,N) tile
    evec = 8 * 128 * itemsize                                       # padded (1,N) tile
    # v block (x2 double-buffer) + out block (x2 double-buffer)
    # + ~2 block-sized f32 temporaries (scaled operand, einsum result)
    # + e block (x2 double-buffer)
    per_mat = 6 * mat + 2 * evec
    max_tb_mem = max(1, budget_bytes // per_mat)

    if num_cores > 1 and B >= 2 * num_cores:
        # Keep >= 2 grid steps per TensorCore so double-buffering can overlap.
        tb_cap = max(1, B // (2 * num_cores))
    else:
        tb_cap = B

    tb_max = max(1, min(B, max_tb_mem, tb_cap))
    for tb in range(tb_max, 0, -1):
        if B % tb == 0:
            return tb
    return 1


def reeig_forward(x, ep):
    """ReEig forward. x: (B, N, N) symmetric float32. Returns (B, N, N) float32."""
    B, N, _ = x.shape
    # Glue: symmetric eigendecomposition per batch element (no Pallas equivalent).
    e, v = jnp.linalg.eigh(x.astype(jnp.float32))   # e: (B, N), v: (B, N, N)
    e3 = e.reshape(B, 1, N)                          # last two dims == full extents

    vmem_phys, num_cores = _tpu_info()
    # ~75% of physical VMEM as the scoped limit (48 MiB on v7x, 96 MiB on
    # v5e/v6e), and ~85% of that as the tiling budget for headroom.
    vmem_limit = min((vmem_phys * 3) // 4, 100 << 20)
    budget = (vmem_limit * 85) // 100

    TB = _choose_tb(B, N, budget, num_cores)
    grid = (B // TB,)

    kernel = functools.partial(_reeig_kernel, ep=float(ep))

    flops = 2 * B * N * N * N                        # batched (N,N)x(N,N) matmuls
    bytes_accessed = (2 * B * N * N + B * N) * 4     # read V + write out + read e

    out = pl.pallas_call(
        kernel,
        out_shape=jax.ShapeDtypeStruct((B, N, N), jnp.float32),
        grid_spec=pltpu.PrefetchScalarGridSpec(
            num_scalar_prefetch=0,
            grid=grid,
            in_specs=[
                pl.BlockSpec((TB, 1, N), lambda b: (b, 0, 0)),
                pl.BlockSpec((TB, N, N), lambda b: (b, 0, 0)),
            ],
            out_specs=pl.BlockSpec((TB, N, N), lambda b: (b, 0, 0)),
        ),
        compiler_params=pltpu.CompilerParams(
            dimension_semantics=("parallel",),
            vmem_limit_bytes=int(vmem_limit),
        ),
        cost_estimate=pl.CostEstimate(
            flops=flops, transcendentals=0, bytes_accessed=bytes_accessed),
    )(e3, v)
    return out


class ReEig:
    """JAX/Pallas analogue of the PyTorch ReEig module (forward only)."""

    def __init__(self, ep):
        self.ep = ep

    def __call__(self, x):
        return reeig_forward(x, self.ep)


if __name__ == "__main__":
    key = jax.random.PRNGKey(0)
    B, N = 2, 32
    ep = 0.1

    # Deterministic SPD batch: A = X X^T / N + small diagonal jitter.
    x_raw = jax.random.normal(key, (B, N, N), dtype=jnp.float32)
    spd = jnp.einsum("bij,bkj->bik", x_raw, x_raw) / N
    spd = spd + 1e-3 * jnp.eye(N, dtype=jnp.float32)[None]

    mod = ReEig(ep)
    out = mod(spd)
    out = jax.block_until_ready(out)

    # Reference (plain JAX) check of the same semantics.
    e_ref, v_ref = jnp.linalg.eigh(spd)
    e_ref = jnp.maximum(e_ref, ep)
    ref = jnp.einsum("bij,bj,bkj->bik", v_ref, e_ref, v_ref)

    assert out.shape == (B, N, N)
    assert out.dtype == jnp.float32
    assert jnp.allclose(out, ref, atol=1e-4, rtol=1e-4), (
        float(jnp.max(jnp.abs(out - ref))))
    print("KERNEL_OK")
</pallas_src>

<mosaic_0001>
module attributes {stable_mosaic.version = 11 : i64} {
  func.func @_reeig_kernel(%arg0: i32, %arg1: memref<2x1x32xf32, #tpu.memory_space<vmem>>, %arg2: memref<2x32x32xf32, #tpu.memory_space<vmem>>, %arg3: memref<2x32x32xf32, #tpu.memory_space<vmem>>) attributes {dimension_semantics = [#tpu.dimension_semantics<parallel>], iteration_bounds = array<i64: 1>, scalar_prefetch = 0 : i64, scratch_operands = 0 : i64, tpu.core_type = #tpu.core_type<tc>, window_params = [{transform_indices = @transform_0, window_bounds = array<i64: 2, 1, 32>}, {transform_indices = @transform_1, window_bounds = array<i64: 2, 32, 32>}, {transform_indices = @transform_2, window_bounds = array<i64: 2, 32, 32>}]} {
    %c0 = arith.constant 0 : index
    %c0_0 = arith.constant 0 : index
    %c0_1 = arith.constant 0 : index
    %0 = vector.load %arg1[%c0, %c0_0, %c0_1] : memref<2x1x32xf32, #tpu.memory_space<vmem>>, vector<2x1x32xf32>
    %cst = arith.constant 1.000000e-01 : f32
    %1 = vector.broadcast %cst : f32 to vector<2x1x32xf32>
    %2 = arith.maximumf %0, %1 : vector<2x1x32xf32>
    %c0_2 = arith.constant 0 : index
    %c0_3 = arith.constant 0 : index
    %c0_4 = arith.constant 0 : index
    %3 = vector.load %arg2[%c0_2, %c0_3, %c0_4] : memref<2x32x32xf32, #tpu.memory_space<vmem>>, vector<2x32x32xf32>
    %4 = vector.broadcast %2 : vector<2x1x32xf32> to vector<2x32x32xf32>
    %5 = arith.mulf %3, %4 : vector<2x32x32xf32>
    "tpu.trace_start"() <{level = 10 : i32, message = "bij,bkj->bik"}> : () -> ()
    %cst_5 = arith.constant dense<0.000000e+00> : vector<2x32x32xf32>
    %6 = tpu.matmul %5, %3, %cst_5 {dimension_numbers = #tpu.dot_dimension_numbers<[2], [2], [1], [1], [0, 0, 0, 1, 1, 1], [0], [0]>} : vector<2x32x32xf32>, vector<2x32x32xf32>, vector<2x32x32xf32> -> vector<2x32x32xf32>
    "tpu.trace_stop"() : () -> ()
    %c0_6 = arith.constant 0 : index
    %c0_7 = arith.constant 0 : index
    %c0_8 = arith.constant 0 : index
    %7 = vector.load %arg3[%c0_6, %c0_7, %c0_8] : memref<2x32x32xf32, #tpu.memory_space<vmem>>, vector<2x32x32xf32>
    tpu.vector_store %arg3[%c0_6, %c0_7, %c0_8], %6 {strides = array<i32>} : memref<2x32x32xf32, #tpu.memory_space<vmem>>, vector<2x32x32xf32>,
    return
  }
  func.func @transform_0(%arg0: i32) -> (i32, i32, i32) {
    %c0_i32 = arith.constant 0 : i32
    %c0_i32_0 = arith.constant 0 : i32
    %c0_i32_1 = arith.constant 0 : i32
    return %arg0, %c0_i32, %c0_i32_0 : i32, i32, i32
  }
  func.func @transform_1(%arg0: i32) -> (i32, i32, i32) {
    %c0_i32 = arith.constant 0 : i32
    %c0_i32_0 = arith.constant 0 : i32
    %c0_i32_1 = arith.constant 0 : i32
    return %arg0, %c0_i32, %c0_i32_0 : i32, i32, i32
  }
  func.func @transform_2(%arg0: i32) -> (i32, i32, i32) {
    %c0_i32 = arith.constant 0 : i32
    %c0_i32_0 = arith.constant 0 : i32
    %c0_i32_1 = arith.constant 0 : i32
    return %arg0, %c0_i32, %c0_i32_0 : i32, i32, i32
  }
}

</mosaic_0001>

<bundles_post_ra>
// kernel: tpu_custom_call.1
= control target key start
LH: loop header
LB: loop body
LE: loop exit
PB: predicated region body
PF: predicated region fallthrough
CT: control target
= control target key end

     0   :  { %7 = vsyncpa [#allocation3], 0  ;;  %s582_s0 = inlined_call_operand.hbm [shape: f32[2,1,32], index: 0, kind: input, shape index: {}]   ;;  %s583_s1 = inlined_call_operand.hbm [shape: f32[2,32,32], index: 1, kind: input, shape index: {}]   ;;  %s584_s2 = inlined_call_operand.hbm [shape: f32[2,32,32], index: 2, kind: output, shape index: {}]  }
   0x1   :  { %8 = vsyncpa [#allocation6], 0 }
   0x2   :  { %9 = vsyncpa [#allocation4], 0  ;;  %s480_s9 = smov [#allocation2]   ;;  %s408_s13 = scalar_lea.hbm %s582_s0, 32 }
   0x3   :  { %s15_s10 = sshll.u32 %s480_s9, 4  ;;  %p409_p0 = scmp.ne.s32.totalorder %s582_s0, %s408_s13  ;;  %s16_s10 = int_to_ptr.vmem [resolvable:$true] %s15_s10 }
   0x4   :  { %p412_p1 = scmp.lt.u32.totalorder %s408_s13, %s582_s0 }
   0x6   :  { %p414_p2 = pnand %p412_p1, %p409_p0 }
   0x8   :  { %417 = shalt.err (!%p414_p2)
}
   0x9   :  { %s418_s18 = scalar_lea.vmem %s16_s10, 32  ;;  %p423_p4 = scmp.lt.s32.totalorder %s16_s10, %s16_s10 }
   0xa   :  { %p419_p3 = scmp.ne.s32.totalorder %s16_s10, %s418_s18  ;;  %p424_p5 = scmp.lt.s32.totalorder %s418_s18, %s418_s18 }
   0xc   :  { %p425_p6 = por %p424_p5, %p423_p4 }
   0xe   :  { %p426_p7 = pnand %p425_p6, %p419_p3 }
  0x10   :  { %429 = shalt.err (!%p426_p7)
}
  0x11   :  { %s481_s19 = smov 16   ;;  %s482_s20 = smov 1  }
  0x12   :  { %21 = dma.hbm_to_vmem [thread:$0]  %s582_s0, 32, %s16_s10, [#allocation3], %s481_s19, %s481_s19, %s482_s20  }
  0x13   :  { %s483_s23 = smov [#allocation5]   ;;  %s430_s27 = scalar_lea.hbm %s583_s1, 1024 }
  0x14   :  { %s27_s24 = sshll.u32 %s483_s23, 4  ;;  %p431_p8 = scmp.ne.s32.totalorder %s583_s1, %s430_s27  ;;  %s28_s24 = int_to_ptr.vmem [resolvable:$true] %s27_s24 }
  0x15   :  { %p434_p9 = scmp.lt.u32.totalorder %s430_s27, %s583_s1 }
  0x17   :  { %p436_p10 = pnand %p434_p9, %p431_p8 }
  0x19   :  { %439 = shalt.err (!%p436_p10)
}
  0x1a   :  { %s440_s4 = scalar_lea.vmem %s28_s24, 1024  ;;  %p445_p12 = scmp.lt.s32.totalorder %s28_s24, %s28_s24 }
  0x1b   :  { %p441_p11 = scmp.ne.s32.totalorder %s28_s24, %s440_s4  ;;  %p446_p13 = scmp.lt.s32.totalorder %s440_s4, %s440_s4 }
  0x1d   :  { %p447_p0 = por %p446_p13, %p445_p12 }
  0x1f   :  { %p448_p1 = pnand %p447_p0, %p441_p11 }
  0x21   :  { %451 = shalt.err (!%p448_p1)
}
  0x22   :  { %s484_s0 = smov 128   ;;  %s485_s5 = smov 8  }
  0x23   :  { %33 = dma.hbm_to_vmem [thread:$0]  %s583_s1, 1024, %s28_s24, [#allocation6], %s484_s0, %s484_s0, %s485_s5  }
  0x24   :  { %474 = dma.done.wait [#allocation3], 32  }
  0x25   :  { %475 = vsyncadd [#allocation3], 4294967264 }
  0x26   :  { %476 = dma.done.wait [#allocation6], 1024  }
  0x27   :  { %477 = vsyncadd [#allocation6], 4294966272  ;;  %v54_v0 = vlaneseq  ;;  %vm72_vm0 = vcmask 261120   ;;  %v40_v4 = vld [vmem:[#allocation2] sm:$0x1]  ;;  %v44_v5 = vld [vmem:[#allocation5] sm:$0xff] }
  0x28   :  { %vm531_vm1 = vmpackc.low %vm72_vm0, %vm72_vm0  ;;  %v45_v6 = vld [vmem:[#allocation5 + $0x8] sm:$0xff]  ;;  %v42_v7 = vmax.f32 %v40_v4, 0.1  ;;  %v41_v9 = vld [vmem:[#allocation2 + $0x1] sm:$0x1]  ;;  %s486_s1 = smov [#allocation7]  }
  0x29   :  { %v55_v1 = vshrl.u32 %v54_v0, 7  ;;  %v377_v8 = vpack.c.bf16 %v45_v6, %v44_v5  ;;  %v48_v10 = vld [vmem:[#allocation5 + $0x20] sm:$0xff]  ;;  %v49_v11 = vld [vmem:[#allocation5 + $0x28] sm:$0xff]  ;;  %v43_v12 = vmax.f32 %v41_v9, 0.1  ;;  %v46_v14 = vld [vmem:[#allocation5 + $0x10] sm:$0xff] }
  0x2a   :  { %v389_v13 = vpack.c.bf16 %v49_v11, %v48_v10  ;;  %v47_v15 = vld [vmem:[#allocation5 + $0x18] sm:$0xff]  ;;  %v50_v16 = vld [vmem:[#allocation5 + $0x30] sm:$0xff]  ;;  %s304_s8 = sshll.u32 %s486_s1, 4  ;;  %s305_s8 = int_to_ptr.vmem [resolvable:$true] %s304_s8 }
  0x2b   :  { %v56_v2 = vsub.s32 0, %v55_v1  ;;  %379 = vmatprep.subr.msk.bf16.mxu0 %vm531_vm1, %v377_v8  ;;  %v383_v18 = vpack.c.bf16 %v47_v15, %v46_v14  ;;  %v51_v19 = vld [vmem:[#allocation5 + $0x38] sm:$0xff]  ;;  %s452_s9 = scalar_lea.vmem %s305_s8, 1024  ;;  %p457_p3 = scmp.lt.s32.totalorder %s305_s8, %s305_s8 }
  0x2c   :  { %391 = vmatprep.subr.msk.bf16.mxu1 %vm531_vm1, %v389_v13  ;;  %382 = vmatpush3.bf16.xpose.msk.msra.mxu0 %vm531_vm1, %v377_v8  ;;  %v395_v21 = vpack.c.bf16 %v51_v19, %v50_v16  ;;  %p453_p2 = scmp.ne.s32.totalorder %s305_s8, %s452_s9  ;;  %p458_p4 = scmp.lt.s32.totalorder %s452_s9, %s452_s9 }
  0x2d   :  { %v57_v17 = vrot.slane %v42_v7, %v56_v2  ;;  %v61_v20 = vrot.slane %v43_v12, %v56_v2  ;;  %394 = vmatpush3.bf16.xpose.msk.msra.mxu1 %vm531_vm1, %v389_v13  ;;  %385 = vmatprep.subr.msk.bf16.mxu0 %vm531_vm1, %v383_v18 }
  0x2e   :  { %397 = vmatprep.subr.msk.bf16.mxu1 %vm531_vm1, %v395_v21  ;;  %p459_p5 = por %p458_p4, %p457_p3 }
  0x2f   :  { %v64_v22 = vmul.f32 %v57_v17, %v44_v5  ;;  %v68_v23 = vmul.f32 %v61_v20, %v48_v10  ;;  %v65_v24 = vmul.f32 %v57_v17, %v45_v6  ;;  %v69_v25 = vmul.f32 %v61_v20, %v49_v11 }
  0x30   :  { %v66_v26 = vmul.f32 %v57_v17, %v46_v14  ;;  %v70_v27 = vmul.f32 %v61_v20, %v50_v16  ;;  %v67_v28 = vmul.f32 %v57_v17, %v47_v15  ;;  %v71_v29 = vmul.f32 %v61_v20, %v51_v19  ;;  %p460_p6 = pnand %p459_p5, %p453_p2 }
  0x31   :  { %357 = vmatprep.mubr.msk.f32.mxu0 %vm72_vm0, %v64_v22  ;;  %371 = vmatprep.mubr.msk.f32.mxu1 %vm72_vm0, %v68_v23 }
  0x34   :  { %388 = vmatpush3.bf16.xpose.msk.msra.mxu0 %vm531_vm1, %v383_v18 }
  0x35   :  { %400 = vmatpush3.bf16.xpose.msk.msra.mxu1 %vm531_vm1, %v395_v21 }
  0x3b   :  { %358 = vmatmul.mubr.msk.f32.vlgmr.msra.gmra.mrb[0].mxu0 %vm72_vm0, %v65_v24 }
  0x3c   :  { %372 = vmatmul.mubr.msk.f32.vlgmr.msra.gmra.mrb[0].mxu1 %vm72_vm0, %v69_v25  ;;  %360 = vmatprep.mubr.msk.f32.mxu0 %vm72_vm0, %v66_v26 }
  0x3d   :  { %374 = vmatprep.mubr.msk.f32.mxu1 %vm72_vm0, %v70_v27 }
  0x3f   :  { %361 = vmatmul.mubr.msk.f32.gmra.mrb[2].mxu0 %vm72_vm0, %v67_v28 }
  0x40   :  { %375 = vmatmul.mubr.msk.f32.gmra.mrb[2].mxu1 %vm72_vm0, %v71_v29 }
 0x10e   :  { %v359_v30 = vpop.f32.mrb[0].mxu0 }
 0x10f   :  { %292 = vst.msk [vmem:[#allocation7 + $0x8] sm:$0xff] %vm72_vm0, %v359_v30  ;;  %v373_v31 = vpop.f32.mrb[0].mxu1  ;;  %v163_v32 = vpop.f32.mrb[1].mxu0 }
 0x110   :  { %296 = vst.msk [vmem:[#allocation7 + $0x28] sm:$0xff] %vm72_vm0, %v373_v31  ;;  %291 = vst.msk [vmem:[#allocation7] sm:$0xff] %vm72_vm0, %v163_v32  ;;  %v272_v33 = vpop.f32.mrb[1].mxu1 }
 0x111   :  { %295 = vst.msk [vmem:[#allocation7 + $0x20] sm:$0xff] %vm72_vm0, %v272_v33 }
 0x112   :  { %v362_v34 = vpop.f32.mrb[2].mxu0 }
 0x113   :  { %294 = vst.msk [vmem:[#allocation7 + $0x18] sm:$0xff] %vm72_vm0, %v362_v34  ;;  %v376_v35 = vpop.f32.mrb[2].mxu1  ;;  %v173_v36 = vpop.f32.mrb[3].mxu0 }
 0x114   :  { %298 = vst.msk [vmem:[#allocation7 + $0x38] sm:$0xff] %vm72_vm0, %v376_v35  ;;  %293 = vst.msk [vmem:[#allocation7 + $0x10] sm:$0xff] %vm72_vm0, %v173_v36  ;;  %v282_v37 = vpop.f32.mrb[3].mxu1 }
 0x115   :  { %297 = vst.msk [vmem:[#allocation7 + $0x30] sm:$0xff] %vm72_vm0, %v282_v37 }
 0x116   :  { %463 = shalt.err (!%p460_p6)
}
 0x117   :  { %s464_s12 = scalar_lea.hbm %s584_s2, 1024 }
 0x118   :  { %p465_p7 = scmp.ne.s32.totalorder %s584_s2, %s464_s12  ;;  %p468_p8 = scmp.lt.u32.totalorder %s464_s12, %s584_s2 }
 0x11a   :  { %p470_p9 = pnand %p468_p8, %p465_p7 }
 0x11c   :  { %473 = shalt.err (!%p470_p9)
}
 0x11d   :  { %310 = dma.vmem_to_hbm [thread:$0]  %s305_s8, 1024, %s584_s2, [#allocation4], %s484_s0, %s484_s0, %s485_s5  }
 0x11e   :  { %478 = dma.done.wait [#allocation4], 1024  }
 0x11f   :  { %479 = vsyncadd [#allocation4], 4294966272 }
 0x120   :  { %314 = vsyncpa [#allocation3], 1 }
 0x121   :  { %315 = vsyncpa [#allocation6], 1 }
 0x122   :  { %316 = vsyncpa [#allocation4], 1 }

</bundles_post_ra>
